<compile_context>
chip_gen: v7x
topology: tpu7x:2x2x1
jax: 0.10.0
libtpu: 0.0.40
codegen_flags: <defaults>
</compile_context>

<pallas_src>
import jax
import jax.numpy as jnp
from jax.experimental import pallas as pl
from jax.experimental.pallas import tpu as pltpu
import numpy as np


def _round_up(x, m):
    return (x + m - 1) // m * m


def joint_kernel(f_ref, g_ref, w1f_ref, w1g_ref, b1_ref, w2_ref, b2_ref,
                 o_ref, h_ref):
    # fc1 + tanh computed once per row tile (first N tile only) into the f32
    # VMEM scratch; concat(f, g) @ W1 is realised as two partial dots
    # (identical MXU flops, one extra f32 accumulate).
    @pl.when(pl.program_id(1) == 0)
    def _():
        h = jnp.dot(f_ref[...], w1f_ref[...],
                    preferred_element_type=jnp.float32)
        h = h + jnp.dot(g_ref[...], w1g_ref[...],
                        preferred_element_type=jnp.float32)
        # Bias + tanh in f32 (v5e VPU/EUP have no bf16 datapath).
        h_ref[...] = jnp.tanh(h + b1_ref[...])

    # Dropout layers are identity in eval mode.
    # TODO(synk): training-mode dropout would need pltpu.prng_seed /
    # pltpu.prng_random_bits masking here.
    o = jnp.dot(h_ref[...].astype(w2_ref.dtype), w2_ref[...],
                preferred_element_type=jnp.float32)
    o_ref[...] = (o + b2_ref[...]).astype(o_ref.dtype)


def joint_layer(f, g, params, *, tm=1024, tn=512):
    """f: (B,T,U,Hf), g: (B,T,U,Hg)  ->  (B,T,U,output_size)."""
    B, T, U, Hf = f.shape
    Hg = g.shape[-1]
    assert f.shape[:3] == g.shape[:3], "f and g must match on (B, T, U)"
    assert f.dtype == g.dtype, "f and g must share a dtype"
    M = B * T * U

    w1, b1, w2, b2 = params["w1"], params["b1"], params["w2"], params["b2"]
    Hin = Hf + Hg
    hidden = w1.shape[1]
    out_size = w2.shape[1]
    assert w1.shape[0] == Hin

    # Lane-dense padded widths (weight side only).
    Hp = _round_up(hidden, 128)
    Np = _round_up(out_size, 128)

    # ---- output (N / vocab) tile: largest 128-multiple divisor of Np <= tn --
    tn_eff = min(max(tn, 128), Np)
    while Np % tn_eff != 0:
        tn_eff -= 128
    n_n = Np // tn_eff

    # ---- row (M) tile -------------------------------------------------------
    tm_eff = min(tm, _round_up(M, 8))
    if pl.cdiv(M, tm_eff) < 2 and M > 256:
        # Keep >= 2 "parallel" grid steps so v7x's two TensorCores get work.
        tm_eff = _round_up(pl.cdiv(M, 2), 8)

    in_bytes = jnp.dtype(f.dtype).itemsize
    w_bytes = jnp.dtype(w1.dtype).itemsize
    out_bytes = in_bytes

    # Single-buffer the grid-invariant fc1 weights once their double-buffer
    # cost is non-trivial (saves VMEM on v7x for realistic hidden sizes).
    w1_blk_bytes = (Hin * Hp + Hp) * w_bytes
    single_buffer_w1 = w1_blk_bytes > (2 << 20)
    w1_kwargs = {"pipeline_mode": pl.Buffered(1)} if single_buffer_w1 else {}

    def vmem_estimate(tm_):
        return (2 * tm_ * Hin * in_bytes                    # f + g tiles (dbl-buffered)
                + 2 * tm_ * tn_eff * out_bytes              # output tile
                + 2 * (Hp * tn_eff + tn_eff) * w_bytes      # W2 / b2 tiles
                + (1 if single_buffer_w1 else 2) * w1_blk_bytes
                + tm_ * Hp * 4)                             # f32 h scratch

    # Shrink the row tile until the working set fits a conservative ~40 MiB
    # budget (safe within v7x's 64 MiB VMEM; plenty of room on v5e/v6e).
    while vmem_estimate(tm_eff) > (40 << 20) and tm_eff > 256:
        tm_eff = _round_up(tm_eff // 2, 8)
    n_m = pl.cdiv(M, tm_eff)
    Mp = n_m * tm_eff
    vmem_limit = int(min(max(vmem_estimate(tm_eff) + (8 << 20), 16 << 20),
                         64 << 20))

    # ---- operands: no concat, no feature-dim padding of activations ---------
    f2 = f.reshape(M, Hf)
    g2 = g.reshape(M, Hg)
    if Mp != M:  # cheap row pad only when the tile does not divide M
        f2 = jnp.pad(f2, ((0, Mp - M), (0, 0)))
        g2 = jnp.pad(g2, ((0, Mp - M), (0, 0)))

    # Split W1 at the concat boundary; pad hidden/output dims (exact: padded
    # hidden cols give tanh(0)=0 and multiply zero rows of W2; padded output
    # cols are zero and sliced off).
    w1f = jnp.pad(w1[:Hf], ((0, 0), (0, Hp - hidden)))
    w1g = jnp.pad(w1[Hf:], ((0, 0), (0, Hp - hidden)))
    b1p = jnp.pad(b1.reshape(1, hidden), ((0, 0), (0, Hp - hidden)))
    w2p = jnp.pad(w2, ((0, Hp - hidden), (0, Np - out_size)))
    b2p = jnp.pad(b2.reshape(1, out_size), ((0, 0), (0, Np - out_size)))

    cost = pl.CostEstimate(
        flops=2 * M * (Hin * hidden + hidden * out_size),
        transcendentals=M * hidden,
        bytes_accessed=(M * Hin * in_bytes + Mp * Np * out_bytes
                        + (Hin * Hp + Hp * Np + Hp + Np) * w_bytes),
    )

    out = pl.pallas_call(
        joint_kernel,
        out_shape=jax.ShapeDtypeStruct((Mp, Np), f.dtype),
        grid_spec=pltpu.PrefetchScalarGridSpec(
            num_scalar_prefetch=0,
            grid=(n_m, n_n),
            in_specs=[
                # Streaming activations: index map ignores j, so Pallas only
                # DMAs them once per row tile.
                pl.BlockSpec((tm_eff, Hf), lambda i, j: (i, 0)),
                pl.BlockSpec((tm_eff, Hg), lambda i, j: (i, 0)),
                # Grid-invariant fc1 weights (DMA'd once).
                pl.BlockSpec((Hf, Hp), lambda i, j: (0, 0), **w1_kwargs),
                pl.BlockSpec((Hg, Hp), lambda i, j: (0, 0), **w1_kwargs),
                pl.BlockSpec((1, Hp), lambda i, j: (0, 0), **w1_kwargs),
                # Vocab-tiled fc2 weights.
                pl.BlockSpec((Hp, tn_eff), lambda i, j: (0, j)),
                pl.BlockSpec((1, tn_eff), lambda i, j: (0, j)),
            ],
            out_specs=pl.BlockSpec((tm_eff, tn_eff), lambda i, j: (i, j)),
            scratch_shapes=[pltpu.VMEM((tm_eff, Hp), jnp.float32)],
        ),
        compiler_params=pltpu.CompilerParams(
            # M axis parallel (v7x megacore sharding); N axis carries the
            # h scratch, so it must stay "arbitrary".
            dimension_semantics=("parallel", "arbitrary"),
            vmem_limit_bytes=vmem_limit),
        cost_estimate=cost,
    )(f2, g2, w1f, w1g, b1p, w2p, b2p)

    # Strip padding only when it exists (skip the extra XLA pass otherwise).
    if Mp != M or Np != out_size:
        out = out[:M, :out_size]
    return out.reshape(B, T, U, out_size)


def init_params(key, input_size, hidden_size, output_size, dtype=jnp.float32):
    """Deterministic init mimicking torch.nn.Linear (U(-1/sqrt(fan_in), ...))."""
    k1, k2, k3, k4 = jax.random.split(key, 4)
    bound1 = 1.0 / np.sqrt(input_size)
    bound2 = 1.0 / np.sqrt(hidden_size)
    # fc1/fc2 weights stored pre-transposed: (in_features, out_features).
    w1 = jax.random.uniform(k1, (input_size, hidden_size), dtype,
                            minval=-bound1, maxval=bound1)
    b1 = jax.random.uniform(k2, (1, hidden_size), dtype,
                            minval=-bound1, maxval=bound1)
    w2 = jax.random.uniform(k3, (hidden_size, output_size), dtype,
                            minval=-bound2, maxval=bound2)
    b2 = jax.random.uniform(k4, (1, output_size), dtype,
                            minval=-bound2, maxval=bound2)
    return w1, b1, w2, b2


if __name__ == "__main__":
    # Small shapes implied by forward: f,g are (B,T,U,H); input_size = 2*H.
    B, T, U, H = 2, 8, 4, 32
    hidden_size = 32
    output_size = 16
    input_size = 2 * H

    key = jax.random.PRNGKey(0)
    kf, kg, kp = jax.random.split(key, 3)
    f = jax.random.normal(kf, (B, T, U, H), jnp.float32)
    g = jax.random.normal(kg, (B, T, U, H), jnp.float32)

    w1, b1, w2, b2 = init_params(kp, input_size, hidden_size, output_size)
    params = {"w1": w1, "b1": b1, "w2": w2, "b2": b2}

    out = joint_layer(f, g, params)
    out = jax.block_until_ready(out)

    # Pure-JAX reference of the PyTorch forward (eval mode).
    x = jnp.concatenate([f, g], axis=-1)
    ref = jnp.tanh(x.reshape(-1, input_size) @ w1 + b1)
    ref = (ref @ w2 + b2).reshape(B, T, U, output_size)

    np.testing.assert_allclose(np.asarray(out), np.asarray(ref),
                               rtol=1e-5, atol=1e-5)
    print("KERNEL_OK")
</pallas_src>

<mosaic_0001>
module attributes {stable_mosaic.version = 11 : i64} {
  func.func @joint_kernel(%arg0: i32, %arg1: i32, %arg2: memref<64x32xf32, #tpu.memory_space<vmem>>, %arg3: memref<64x32xf32, #tpu.memory_space<vmem>>, %arg4: memref<32x128xf32, #tpu.memory_space<vmem>>, %arg5: memref<32x128xf32, #tpu.memory_space<vmem>>, %arg6: memref<1x128xf32, #tpu.memory_space<vmem>>, %arg7: memref<128x128xf32, #tpu.memory_space<vmem>>, %arg8: memref<1x128xf32, #tpu.memory_space<vmem>>, %arg9: memref<64x128xf32, #tpu.memory_space<vmem>>, %arg10: memref<64x128xf32, #tpu.memory_space<vmem>>) attributes {dimension_semantics = [#tpu.dimension_semantics<parallel>, #tpu.dimension_semantics<arbitrary>], iteration_bounds = array<i64: 1, 1>, scalar_prefetch = 0 : i64, scratch_operands = 1 : i64, tpu.core_type = #tpu.core_type<tc>, window_params = [{transform_indices = @transform_0, window_bounds = array<i64: 64, 32>}, {transform_indices = @transform_1, window_bounds = array<i64: 64, 32>}, {pipeline_mode = #tpu.pipeline_mode<synchronous>, transform_indices = @transform_2, window_bounds = array<i64: 32, 128>}, {pipeline_mode = #tpu.pipeline_mode<synchronous>, transform_indices = @transform_3, window_bounds = array<i64: 32, 128>}, {pipeline_mode = #tpu.pipeline_mode<synchronous>, transform_indices = @transform_4, window_bounds = array<i64: 1, 128>}, {transform_indices = @transform_5, window_bounds = array<i64: 128, 128>}, {transform_indices = @transform_6, window_bounds = array<i64: 1, 128>}, {transform_indices = @transform_7, window_bounds = array<i64: 64, 128>}]} {
    %c0_i32 = arith.constant 0 : i32
    %0 = arith.cmpi eq, %arg1, %c0_i32 : i32
    %1 = arith.extui %0 : i1 to i32
    %c0_i32_0 = arith.constant 0 : i32
    %2 = arith.cmpi ne, %1, %c0_i32_0 : i32
    scf.if %2 {
      %c0_8 = arith.constant 0 : index
      %c0_9 = arith.constant 0 : index
      %10 = vector.load %arg2[%c0_8, %c0_9] : memref<64x32xf32, #tpu.memory_space<vmem>>, vector<64x32xf32>
      %c0_10 = arith.constant 0 : index
      %c0_11 = arith.constant 0 : index
      %11 = vector.load %arg4[%c0_10, %c0_11] : memref<32x128xf32, #tpu.memory_space<vmem>>, vector<32x128xf32>
      %cst_12 = arith.constant dense<0.000000e+00> : vector<64x128xf32>
      %12 = tpu.matmul %10, %11, %cst_12 {dimension_numbers = #tpu.dot_dimension_numbers<[1], [0], [0], [1], [0, 0, 1, 1], [], []>} : vector<64x32xf32>, vector<32x128xf32>, vector<64x128xf32> -> vector<64x128xf32>
      %c0_13 = arith.constant 0 : index
      %c0_14 = arith.constant 0 : index
      %13 = vector.load %arg3[%c0_13, %c0_14] : memref<64x32xf32, #tpu.memory_space<vmem>>, vector<64x32xf32>
      %c0_15 = arith.constant 0 : index
      %c0_16 = arith.constant 0 : index
      %14 = vector.load %arg5[%c0_15, %c0_16] : memref<32x128xf32, #tpu.memory_space<vmem>>, vector<32x128xf32>
      %cst_17 = arith.constant dense<0.000000e+00> : vector<64x128xf32>
      %15 = tpu.matmul %13, %14, %cst_17 {dimension_numbers = #tpu.dot_dimension_numbers<[1], [0], [0], [1], [0, 0, 1, 1], [], []>} : vector<64x32xf32>, vector<32x128xf32>, vector<64x128xf32> -> vector<64x128xf32>
      %16 = arith.addf %12, %15 : vector<64x128xf32>
      %c0_18 = arith.constant 0 : index
      %c0_19 = arith.constant 0 : index
      %17 = vector.load %arg6[%c0_18, %c0_19] : memref<1x128xf32, #tpu.memory_space<vmem>>, vector<1x128xf32>
      %18 = vector.broadcast %17 : vector<1x128xf32> to vector<64x128xf32>
      %19 = arith.addf %16, %18 : vector<64x128xf32>
      %20 = math.tanh %19 : vector<64x128xf32>
      %c0_20 = arith.constant 0 : index
      %c0_21 = arith.constant 0 : index
      %21 = vector.load %arg10[%c0_20, %c0_21] : memref<64x128xf32, #tpu.memory_space<vmem>>, vector<64x128xf32>
      tpu.vector_store %arg10[%c0_20, %c0_21], %20 {strides = array<i32>} : memref<64x128xf32, #tpu.memory_space<vmem>>, vector<64x128xf32>,
    } else {
    }
    %c0 = arith.constant 0 : index
    %c0_1 = arith.constant 0 : index
    %3 = vector.load %arg10[%c0, %c0_1] : memref<64x128xf32, #tpu.memory_space<vmem>>, vector<64x128xf32>
    %c0_2 = arith.constant 0 : index
    %c0_3 = arith.constant 0 : index
    %4 = vector.load %arg7[%c0_2, %c0_3] : memref<128x128xf32, #tpu.memory_space<vmem>>, vector<128x128xf32>
    %cst = arith.constant dense<0.000000e+00> : vector<64x128xf32>
    %5 = tpu.matmul %3, %4, %cst {dimension_numbers = #tpu.dot_dimension_numbers<[1], [0], [0], [1], [0, 0, 1, 1], [], []>} : vector<64x128xf32>, vector<128x128xf32>, vector<64x128xf32> -> vector<64x128xf32>
    %c0_4 = arith.constant 0 : index
    %c0_5 = arith.constant 0 : index
    %6 = vector.load %arg8[%c0_4, %c0_5] : memref<1x128xf32, #tpu.memory_space<vmem>>, vector<1x128xf32>
    %7 = vector.broadcast %6 : vector<1x128xf32> to vector<64x128xf32>
    %8 = arith.addf %5, %7 : vector<64x128xf32>
    %c0_6 = arith.constant 0 : index
    %c0_7 = arith.constant 0 : index
    %9 = vector.load %arg9[%c0_6, %c0_7] : memref<64x128xf32, #tpu.memory_space<vmem>>, vector<64x128xf32>
    tpu.vector_store %arg9[%c0_6, %c0_7], %8 {strides = array<i32>} : memref<64x128xf32, #tpu.memory_space<vmem>>, vector<64x128xf32>,
    return
  }
  func.func @transform_0(%arg0: i32, %arg1: i32) -> (i32, i32) {
    %c0_i32 = arith.constant 0 : i32
    %c0_i32_0 = arith.constant 0 : i32
    return %arg0, %c0_i32 : i32, i32
  }
  func.func @transform_1(%arg0: i32, %arg1: i32) -> (i32, i32) {
    %c0_i32 = arith.constant 0 : i32
    %c0_i32_0 = arith.constant 0 : i32
    return %arg0, %c0_i32 : i32, i32
  }
  func.func @transform_2(%arg0: i32, %arg1: i32) -> (i32, i32) {
    %c0_i32 = arith.constant 0 : i32
    %c0_i32_0 = arith.constant 0 : i32
    %c0_i32_1 = arith.constant 0 : i32
    return %c0_i32, %c0_i32_0 : i32, i32
  }
  func.func @transform_3(%arg0: i32, %arg1: i32) -> (i32, i32) {
    %c0_i32 = arith.constant 0 : i32
    %c0_i32_0 = arith.constant 0 : i32
    %c0_i32_1 = arith.constant 0 : i32
    return %c0_i32, %c0_i32_0 : i32, i32
  }
  func.func @transform_4(%arg0: i32, %arg1: i32) -> (i32, i32) {
    %c0_i32 = arith.constant 0 : i32
    %c0_i32_0 = arith.constant 0 : i32
    %c0_i32_1 = arith.constant 0 : i32
    return %c0_i32, %c0_i32_0 : i32, i32
  }
  func.func @transform_5(%arg0: i32, %arg1: i32) -> (i32, i32) {
    %c0_i32 = arith.constant 0 : i32
    %c0_i32_0 = arith.constant 0 : i32
    return %c0_i32, %arg1 : i32, i32
  }
  func.func @transform_6(%arg0: i32, %arg1: i32) -> (i32, i32) {
    %c0_i32 = arith.constant 0 : i32
    %c0_i32_0 = arith.constant 0 : i32
    return %c0_i32, %arg1 : i32, i32
  }
  func.func @transform_7(%arg0: i32, %arg1: i32) -> (i32, i32) {
    %c0_i32 = arith.constant 0 : i32
    return %arg0, %arg1 : i32, i32
  }
}

</mosaic_0001>

<bundles_post_ra>
// kernel: tpu_custom_call.1
= control target key start
LH: loop header
LB: loop body
LE: loop exit
PB: predicated region body
PF: predicated region fallthrough
CT: control target
= control target key end

     0   :  { %vm55_vm0 = vcmask 261120   ;;  %s951_s0 = inlined_call_operand.vmem [shape: f32[64,32], index: 0, kind: input, shape index: {}]   ;;  %s952_s1 = inlined_call_operand.vmem [shape: f32[64,32], index: 1, kind: input, shape index: {}]   ;;  %s953_s2 = inlined_call_operand.vmem [shape: f32[32,128], index: 2, kind: input, shape index: {}]   ;;  %s954_s3 = inlined_call_operand.vmem [shape: f32[32,128], index: 3, kind: input, shape index: {}]   ;;  %s955_s4 = inlined_call_operand.vmem [shape: f32[1,128], index: 4, kind: input, shape index: {}]   ;;  %s956_s5 = inlined_call_operand.vmem [shape: f32[128,128], index: 5, kind: input, shape index: {}]   ;;  %s957_s6 = inlined_call_operand.vmem [shape: f32[1,128], index: 6, kind: input, shape index: {}]   ;;  %s958_s7 = inlined_call_operand.hbm [shape: f32[64,128], index: 7, kind: output, shape index: {}]  }
   0x1   :  { %v51_v0 = vld [vmem:[%s954_s3] sm:$0xff]  ;;  %v52_v1 = vld [vmem:[%s954_s3 + $0x8] sm:$0xff]  ;;  %v53_v2 = vld [vmem:[%s954_s3 + $0x10] sm:$0xff] }
   0x2   :  { %v655_v3 = vpack.c.bf16 %v52_v1, %v51_v0  ;;  %v54_v4 = vld [vmem:[%s954_s3 + $0x18] sm:$0xff]  ;;  %v43_v5 = vld [vmem:[%s952_s1] sm:$0xff]  ;;  %v40_v8 = vld [vmem:[%s953_s2 + $0x8] sm:$0xff] }
   0x3   :  { %v659_v6 = vpack.c.bf16 %v54_v4, %v53_v2  ;;  %579 = vmatprep.mubr.msk.f32.mxu0 %vm55_vm0, %v43_v5  ;;  %v39_v7 = vld [vmem:[%s953_s2] sm:$0xff]  ;;  %v41_v10 = vld [vmem:[%s953_s2 + $0x10] sm:$0xff]  ;;  %v42_v11 = vld [vmem:[%s953_s2 + $0x18] sm:$0xff] }
   0x4   :  { %656 = vmatprep.subr.bf16.mxu0 %v655_v3  ;;  %v663_v9 = vpack.c.bf16 %v40_v8, %v39_v7  ;;  %v44_v12 = vld [vmem:[%s952_s1 + $0x8] sm:$0xff]  ;;  %v353_v13 = vld [vmem:[%s956_s5] sm:$0xff]  ;;  %v355_v15 = vld [vmem:[%s956_s5 + $0x10] sm:$0xff]  ;;  %v667_v17 = vpack.c.bf16 %v42_v11, %v41_v10 }
   0x5   :  { %658 = vmatpush3.bf16.msra.mxu0 %v655_v3  ;;  %v354_v14 = vld [vmem:[%s956_s5 + $0x8] sm:$0xff]  ;;  %v45_v16 = vld [vmem:[%s952_s1 + $0x10] sm:$0xff]  ;;  %v356_v19 = vld [vmem:[%s956_s5 + $0x18] sm:$0xff] }
   0x6   :  { %660 = vmatprep.subr.bf16.mxu0 %v659_v6  ;;  %v671_v18 = vpack.c.bf16 %v354_v14, %v353_v13  ;;  %v675_v20 = vpack.c.bf16 %v356_v19, %v355_v15 }
   0x9   :  { %662 = vmatpush3.bf16.msra.mxu0 %v659_v6 }
   0xa   :  { %664 = vmatprep.subr.bf16.mxu0 %v663_v9 }
   0xb   :  { %12 = vsyncpa [#allocation4], 0  ;;  %672 = vmatprep.subr.bf16.mxu1 %v671_v18  ;;  %v357_v21 = vld [vmem:[%s956_s5 + $0x20] sm:$0xff]  ;;  %v358_v22 = vld [vmem:[%s956_s5 + $0x28] sm:$0xff]  ;;  %s754_s28 = smov [#allocation3]  }
   0xc   :  { %580 = vmatmul.mubr.msk.f32.vlgmr.msra.gmra.mrb[0].mxu0 %vm55_vm0, %v44_v12  ;;  %v46_v23 = vld [vmem:[%s952_s1 + $0x18] sm:$0xff]  ;;  %v47_v24 = vld [vmem:[%s952_s1 + $0x20] sm:$0xff]  ;;  %674 = vmatpush3.bf16.msra.mxu1 %v671_v18  ;;  %v679_v25 = vpack.c.bf16 %v358_v22, %v357_v21  ;;  %v359_v26 = vld [vmem:[%s956_s5 + $0x30] sm:$0xff]  ;;  %s494_s29 = sshll.u32 %s754_s28, 4  ;;  %s495_s29 = int_to_ptr.vmem [resolvable:$true] %s494_s29 }
   0xd   :  { %666 = vmatpush3.bf16.msra.mxu0 %v663_v9  ;;  %582 = vmatprep.mubr.msk.f32.mxu0 %vm55_vm0, %v45_v16  ;;  %v360_v27 = vld [vmem:[%s956_s5 + $0x38] sm:$0xff]  ;;  %v48_v28 = vld [vmem:[%s952_s1 + $0x28] sm:$0xff]  ;;  %v49_v29 = vld [vmem:[%s952_s1 + $0x30] sm:$0xff]  ;;  %p735_p1 = scmp.lt.s32.totalorder %s495_s29, %s495_s29 }
   0xe   :  { %668 = vmatprep.subr.bf16.mxu0 %v667_v17  ;;  %676 = vmatprep.subr.bf16.mxu1 %v675_v20  ;;  %v683_v30 = vpack.c.bf16 %v360_v27, %v359_v26  ;;  %v50_v31 = vld [vmem:[%s952_s1 + $0x38] sm:$0xff]  ;;  %v31_v32 = vld [vmem:[%s951_s0] sm:$0xff]  ;;  %v32_v33 = vld [vmem:[%s951_s0 + $0x8] sm:$0xff] }
   0xf   :  { %v33_v34 = vld [vmem:[%s951_s0 + $0x10] sm:$0xff]  ;;  %v34_v35 = vld [vmem:[%s951_s0 + $0x18] sm:$0xff]  ;;  %v35_v36 = vld [vmem:[%s951_s0 + $0x20] sm:$0xff] }
  0x10   :  { %583 = vmatmul.mubr.msk.f32.gmra.mrb[2].mxu0 %vm55_vm0, %v46_v23  ;;  %678 = vmatpush3.bf16.msra.mxu1 %v675_v20  ;;  %v36_v37 = vld [vmem:[%s951_s0 + $0x28] sm:$0xff]  ;;  %v37_v38 = vld [vmem:[%s951_s0 + $0x30] sm:$0xff]  ;;  %v38_v39 = vld [vmem:[%s951_s0 + $0x38] sm:$0xff] }
  0x11   :  { %585 = vmatprep.mubr.msk.f32.mxu0 %vm55_vm0, %v47_v24  ;;  %670 = vmatpush3.bf16.msra.mxu0 %v667_v17  ;;  %v361_v40 = vld [vmem:[%s956_s5 + $0x40] sm:$0xff]  ;;  %v362_v41 = vld [vmem:[%s956_s5 + $0x48] sm:$0xff]  ;;  %v363_v43 = vld [vmem:[%s956_s5 + $0x50] sm:$0xff] }
  0x12   :  { %680 = vmatprep.subr.bf16.mxu1 %v679_v25  ;;  %v687_v42 = vpack.c.bf16 %v362_v41, %v361_v40  ;;  %v364_v44 = vld [vmem:[%s956_s5 + $0x58] sm:$0xff]  ;;  %v365_v46 = vld [vmem:[%s956_s5 + $0x60] sm:$0xff]  ;;  %v366_v47 = vld [vmem:[%s956_s5 + $0x68] sm:$0xff] }
  0x13   :  { %v691_v45 = vpack.c.bf16 %v364_v44, %v363_v43  ;;  %v695_v48 = vpack.c.bf16 %v366_v47, %v365_v46  ;;  %v367_v49 = vld [vmem:[%s956_s5 + $0x70] sm:$0xff]  ;;  %v368_v50 = vld [vmem:[%s956_s5 + $0x78] sm:$0xff]  ;;  %v521_v52 = vld [vmem:[%s955_s4] ss:$0 sm:$0xff] }
  0x14   :  { %586 = vmatmul.mubr.msk.f32.gmra.mrb[4].mxu0 %vm55_vm0, %v48_v28  ;;  %682 = vmatpush3.bf16.msra.mxu1 %v679_v25  ;;  %v699_v51 = vpack.c.bf16 %v368_v50, %v367_v49  ;;  %v522_v13 = vld [vmem:[%s957_s6] ss:$0 sm:$0xff]  ;;  %s730_s6 = scalar_lea.vmem %s495_s29, 1024 }
  0x15   :  { %588 = vmatprep.mubr.msk.f32.mxu0 %vm55_vm0, %v49_v29  ;;  %684 = vmatprep.subr.bf16.mxu1 %v683_v30  ;;  %p731_p0 = scmp.ne.s32.totalorder %s495_s29, %s730_s6  ;;  %p736_p2 = scmp.lt.s32.totalorder %s730_s6, %s730_s6 }
  0x17   :  { %p737_p3 = por %p736_p2, %p735_p1 }
  0x18   :  { %589 = vmatmul.mubr.msk.f32.gmra.mrb[6].mxu0 %vm55_vm0, %v50_v31  ;;  %686 = vmatpush3.bf16.msra.mxu1 %v683_v30 }
  0x19   :  { %599 = vmatprep.mubr.msk.f32.mxu0 %vm55_vm0, %v31_v32  ;;  %688 = vmatprep.subr.bf16.mxu1 %v687_v42  ;;  %p738_p4 = pnand %p737_p3, %p731_p0 }
  0x1c   :  { %600 = vmatmul.mubr.msk.f32.vlgmr.msra.gmra.mrb[0].mxu0 %vm55_vm0, %v32_v33  ;;  %690 = vmatpush3.bf16.msra.mxu1 %v687_v42 }
  0x1d   :  { %602 = vmatprep.mubr.msk.f32.mxu0 %vm55_vm0, %v33_v34  ;;  %692 = vmatprep.subr.bf16.mxu1 %v691_v45 }
  0x20   :  { %603 = vmatmul.mubr.msk.f32.gmra.mrb[2].mxu0 %vm55_vm0, %v34_v35  ;;  %694 = vmatpush3.bf16.msra.mxu1 %v691_v45 }
  0x21   :  { %605 = vmatprep.mubr.msk.f32.mxu0 %vm55_vm0, %v35_v36  ;;  %696 = vmatprep.subr.bf16.mxu1 %v695_v48 }
  0x24   :  { %606 = vmatmul.mubr.msk.f32.gmra.mrb[4].mxu0 %vm55_vm0, %v36_v37  ;;  %698 = vmatpush3.bf16.msra.mxu1 %v695_v48 }
  0x25   :  { %608 = vmatprep.mubr.msk.f32.mxu0 %vm55_vm0, %v37_v38  ;;  %700 = vmatprep.subr.bf16.mxu1 %v699_v51 }
  0x28   :  { %609 = vmatmul.mubr.msk.f32.gmra.mrb[6].mxu0 %vm55_vm0, %v38_v39  ;;  %702 = vmatpush3.bf16.msra.mxu1 %v699_v51 }
  0xef   :  { %v601_v53 = vpop.f32.mrb[0].mxu0 }
  0xf0   :  { %v322_v54 = vadd.f32 %v601_v53, %v521_v52  ;;  %v275_v55 = vpop.f32.mrb[1].mxu0 }
  0xf1   :  { %v321_v56 = vadd.f32 %v521_v52, %v275_v55 }
  0xf3   :  { %714 = vtanh.f32 %v321_v56  ;;  %v604_v57 = vpop.f32.mrb[2].mxu0 }
  0xf4   :  { %716 = vtanh.f32 %v322_v54  ;;  %v324_v58 = vadd.f32 %v604_v57, %v521_v52  ;;  %v285_v59 = vpop.f32.mrb[3].mxu0 }
  0xf5   :  { %v323_v60 = vadd.f32 %v521_v52, %v285_v59 }
  0xf7   :  { %718 = vtanh.f32 %v323_v60  ;;  %v607_v61 = vpop.f32.mrb[4].mxu0 }
  0xf8   :  { %720 = vtanh.f32 %v324_v58  ;;  %v326_v62 = vadd.f32 %v607_v61, %v521_v52  ;;  %v295_v63 = vpop.f32.mrb[5].mxu0 }
  0xf9   :  { %v325_v0 = vadd.f32 %v521_v52, %v295_v63 }
  0xfb   :  { %722 = vtanh.f32 %v325_v0  ;;  %v610_v1 = vpop.f32.mrb[6].mxu0 }
  0xfc   :  { %724 = vtanh.f32 %v326_v62  ;;  %v328_v2 = vadd.f32 %v610_v1, %v521_v52  ;;  %v305_v3 = vpop.f32.mrb[7].mxu0 }
  0xfd   :  { %v715_v4 = vpop.eup %714  ;;  %v327_v5 = vadd.f32 %v521_v52, %v305_v3 }
  0xfe   :  { %v717_v6 = vpop.eup %716  ;;  %643 = vmatprep.mubr.f32.mxu1 %v715_v4 }
  0xff   :  { %726 = vtanh.f32 %v327_v5  ;;  %644 = vmatmul.mubr.f32.vlgmr.msra.gmra.mrb[0].mxu1 %v717_v6 }
 0x100   :  { %728 = vtanh.f32 %v328_v2 }
 0x101   :  { %v719_v7 = vpop.eup %718 }
 0x102   :  { %v721_v8 = vpop.eup %720  ;;  %646 = vmatprep.mubr.f32.mxu1 %v719_v7 }
 0x103   :  { %647 = vmatmul.mubr.f32.gmra.mrb[2].mxu1 %v721_v8 }
 0x105   :  { %v723_v9 = vpop.eup %722 }
 0x106   :  { %v725_v10 = vpop.eup %724  ;;  %649 = vmatprep.mubr.f32.mxu1 %v723_v9 }
 0x107   :  { %650 = vmatmul.mubr.f32.gmra.mrb[4].mxu1 %v725_v10 }
 0x109   :  { %v727_v11 = vpop.eup %726 }
 0x10a   :  { %v729_v12 = vpop.eup %728  ;;  %652 = vmatprep.mubr.f32.mxu1 %v727_v11 }
 0x10b   :  { %653 = vmatmul.mubr.f32.gmra.mrb[6].mxu1 %v729_v12 }
 0x1d2   :  { %v645_v14 = vpop.f32.mrb[0].mxu1 }
 0x1d3   :  { %v448_v15 = vadd.f32 %v645_v14, %v522_v13  ;;  %v442_v16 = vpop.f32.mrb[1].mxu1 }
 0x1d4   :  { %v443_v17 = vadd.f32 %v522_v13, %v442_v16 }
 0x1d5   :  { %482 = vst [vmem:[#allocation3 + $0x8] sm:$0xff] %v448_v15 }
 0x1d6   :  { %481 = vst [vmem:[#allocation3] sm:$0xff] %v443_v17  ;;  %v648_v18 = vpop.f32.mrb[2].mxu1 }
 0x1d7   :  { %v458_v19 = vadd.f32 %v648_v18, %v522_v13  ;;  %v452_v20 = vpop.f32.mrb[3].mxu1 }
 0x1d8   :  { %v453_v21 = vadd.f32 %v522_v13, %v452_v20 }
 0x1d9   :  { %484 = vst [vmem:[#allocation3 + $0x18] sm:$0xff] %v458_v19 }
 0x1da   :  { %483 = vst [vmem:[#allocation3 + $0x10] sm:$0xff] %v453_v21  ;;  %v651_v22 = vpop.f32.mrb[4].mxu1 }
 0x1db   :  { %v468_v23 = vadd.f32 %v651_v22, %v522_v13  ;;  %v462_v24 = vpop.f32.mrb[5].mxu1 }
 0x1dc   :  { %v463_v25 = vadd.f32 %v522_v13, %v462_v24 }
 0x1dd   :  { %486 = vst [vmem:[#allocation3 + $0x28] sm:$0xff] %v468_v23 }
 0x1de   :  { %485 = vst [vmem:[#allocation3 + $0x20] sm:$0xff] %v463_v25  ;;  %v654_v26 = vpop.f32.mrb[6].mxu1 }
 0x1df   :  { %v478_v27 = vadd.f32 %v654_v26, %v522_v13  ;;  %v472_v28 = vpop.f32.mrb[7].mxu1 }
 0x1e0   :  { %v473_v29 = vadd.f32 %v522_v13, %v472_v28 }
 0x1e1   :  { %488 = vst [vmem:[#allocation3 + $0x38] sm:$0xff] %v478_v27 }
 0x1e2   :  { %487 = vst [vmem:[#allocation3 + $0x30] sm:$0xff] %v473_v29 }
 0x1e3   :  { %741 = shalt.err (!%p738_p4)
}
 0x1e4   :  { %s742_s9 = scalar_lea.hbm %s958_s7, 1024 }
 0x1e5   :  { %p743_p5 = scmp.ne.s32.totalorder %s958_s7, %s742_s9  ;;  %p746_p6 = scmp.lt.u32.totalorder %s742_s9, %s958_s7 }
 0x1e7   :  { %p748_p7 = pnand %p746_p6, %p743_p5 }
 0x1e9   :  { %751 = shalt.err (!%p748_p7)
}
 0x1ea   :  { %s755_s14 = smov 128   ;;  %s756_s3 = smov 8  }
 0x1eb   :  { %500 = dma.vmem_to_hbm [thread:$0]  %s495_s29, 1024, %s958_s7, [#allocation4], %s755_s14, %s755_s14, %s756_s3  }
 0x1ec   :  { %752 = dma.done.wait [#allocation4], 1024  }
 0x1ed   :  { %753 = vsyncadd [#allocation4], 4294966272 }
 0x1ee   :  { %504 = vsyncpa [#allocation4], 1 }

</bundles_post_ra>
